<compile_context>
chip_gen: v7x
topology: tpu7x:2x2x1
jax: 0.10.0
libtpu: 0.0.40
codegen_flags: <defaults>
</compile_context>

<pallas_src>
import functools

import numpy as np
import jax
import jax.numpy as jnp
from jax.experimental import pallas as pl
from jax.experimental.pallas import tpu as pltpu


def _round_up(v, m):
    return ((v + m - 1) // m) * m


def _textcnn_fused_kernel(x_ref, w_ref, b_ref, mask_ref, o_ref, *,
                          kmax, out_len_pad, l_pad, e_pad, compute_dtype):
    """Fused TextCNN forward for one batch tile.

    x_ref    : (TB, L, E)            activations (input dtype; cast on-chip)
    w_ref    : (kmax*e_pad, N_pad)   all branches packed along N (compute dtype)
    b_ref    : (1, N_pad)            concatenated biases (f32)
    mask_ref : (out_len_pad, N_pad)  0 for valid (time, col), -1e30 for invalid (f32)
    o_ref    : (1, TB, N_pad)        pooled output (f32)
    """
    tb, seq_len, emb = x_ref.shape
    n_pad = w_ref.shape[1]

    # Cast to the MXU compute dtype once, in VMEM (no extra host-side HBM pass).
    x = x_ref[...].astype(compute_dtype)
    # Pad the lane (embedding) dim to a 128 multiple so the im2col lane-concat aligns.
    if e_pad > emb:
        x = jnp.concatenate(
            [x, jnp.zeros((tb, seq_len, e_pad - emb), compute_dtype)], axis=2)
    # Pad the time dim so every window position in [0, out_len_pad) has kmax taps.
    if l_pad > seq_len:
        x = jnp.concatenate(
            [x, jnp.zeros((tb, l_pad - seq_len, e_pad), compute_dtype)], axis=1)

    # im2col over the WHOLE batch tile: lane-concat the kmax shifted time views,
    # then collapse (TB, out_len_pad) -> TB*out_len_pad (clean: sublane/lane aligned).
    xu = jnp.concatenate([x[:, j:j + out_len_pad, :] for j in range(kmax)], axis=2)
    xu = xu.reshape(tb * out_len_pad, kmax * e_pad)

    # Single MXU matmul for all rows and all conv branches in this tile.
    y = jnp.dot(xu, w_ref[...], preferred_element_type=jnp.float32)
    y = y.reshape(tb, out_len_pad, n_pad)

    # Mask padded / partial-window time rows, then global max-pool over time.
    y = y + mask_ref[...][None, :, :]
    pooled = jnp.max(y, axis=1)                                   # (TB, N_pad) f32

    # bias + ReLU commute with the max -> apply once on the pooled matrix.
    o_ref[0] = jnp.maximum(pooled + b_ref[...], 0.0).astype(o_ref.dtype)


def textcnn_forward(x, weights, biases, *, compute_dtype=jnp.bfloat16, tb_cap=256):
    """TextCNN forward.

    x       : (B, L, E) f32   -- batch, seq_len, embedding_dim (PyTorch pre-permute layout)
    weights : list of (k_i, E, F) f32 conv weights (PyTorch (F, E, k) transposed)
    biases  : list of (F,) f32
    returns : (B, NB*F) f32   == torch.cat([relu(conv_i(x.permute(0,2,1))).max(dim=2)[0]], dim=1)
    """
    B, L, E = x.shape
    ksizes = tuple(int(w.shape[0]) for w in weights)
    nb = len(ksizes)
    F = int(weights[0].shape[2])
    assert all(tuple(w.shape) == (k, E, F) for w, k in zip(weights, ksizes))
    kmax, kmin = max(ksizes), min(ksizes)
    assert kmax <= L

    itemsize = jnp.dtype(compute_dtype).itemsize
    sub = max(8, 32 // itemsize)              # native sublane tile rows (16 for bf16)
    e_pad = _round_up(E, 128)
    n_total = nb * F
    n_pad = _round_up(n_total, 128)
    out_len = L - kmin + 1
    out_len_pad = _round_up(out_len, sub)
    l_pad = _round_up(out_len_pad + kmax - 1, sub)

    # --- Pack ALL branches into one (kmax*e_pad, n_pad) weight -------------------
    # taps flattened into K (zero-padded to kmax taps / e_pad lanes); branches are
    # contiguous along N (matches torch.cat order), N zero-padded once to 128.
    w_cols = []
    for w, k in zip(weights, ksizes):
        wp = jnp.zeros((kmax, e_pad, F), jnp.float32).at[:k, :E, :].set(w)
        w_cols.append(wp.reshape(kmax * e_pad, F))
    w_all = jnp.pad(jnp.concatenate(w_cols, axis=1),
                    ((0, 0), (0, n_pad - n_total))).astype(compute_dtype)

    b_all = jnp.pad(jnp.concatenate([b.astype(jnp.float32) for b in biases]),
                    (0, n_pad - n_total)).reshape(1, n_pad)

    # --- (time, column) validity mask: col of branch i valid for t < L - k_i + 1 ---
    valid_len = np.full((n_pad,), out_len, np.int32)
    for i, k in enumerate(ksizes):
        valid_len[i * F:(i + 1) * F] = L - k + 1
    mask = jnp.asarray(
        np.where(np.arange(out_len_pad)[:, None] < valid_len[None, :], 0.0, -1e30),
        dtype=jnp.float32)

    # --- Batch tile sizing --------------------------------------------------------
    # Biggest TB whose per-step working set stays well under the most restrictive
    # default scoped VMEM (16 MiB on v5e); targets ~1-2 MiB x tiles.
    per_row = (2 * L * E * 4                                 # x tile (f32), double-buffered
               + 2 * out_len_pad * kmax * e_pad * itemsize   # taps + im2col (compute dtype)
               + out_len_pad * n_pad * 4                     # matmul result (f32)
               + 2 * n_pad * 4)                              # output, double-buffered
    budget = 10 * 1024 * 1024
    tb = max(1, min(B, tb_cap, budget // max(per_row, 1)))
    if tb >= 8:
        tb = (tb // 8) * 8
    if B > 1:                    # >= 2 grid steps so both TensorCores are used on v7x
        tb = min(tb, pl.cdiv(B, 2))
    grid_b = pl.cdiv(B, tb)
    b_pad = grid_b * tb
    if b_pad > B:                # keep every block fully in-bounds (no ragged tile)
        x = jnp.pad(x, ((0, b_pad - B), (0, 0), (0, 0)))

    kernel = functools.partial(_textcnn_fused_kernel, kmax=kmax,
                               out_len_pad=out_len_pad, l_pad=l_pad, e_pad=e_pad,
                               compute_dtype=compute_dtype)

    out_padded = pl.pallas_call(
        kernel,
        out_shape=jax.ShapeDtypeStruct((grid_b, tb, n_pad), jnp.float32),
        grid_spec=pltpu.PrefetchScalarGridSpec(
            num_scalar_prefetch=0,
            grid=(grid_b,),
            in_specs=[
                pl.BlockSpec((tb, L, E), lambda g: (g, 0, 0)),
                # constant index_maps -> fetched once, VMEM-resident across the grid
                pl.BlockSpec((kmax * e_pad, n_pad), lambda g: (0, 0)),
                pl.BlockSpec((1, n_pad), lambda g: (0, 0)),
                pl.BlockSpec((out_len_pad, n_pad), lambda g: (0, 0)),
            ],
            out_specs=pl.BlockSpec((1, tb, n_pad), lambda g: (g, 0, 0)),
        ),
        compiler_params=pltpu.CompilerParams(
            dimension_semantics=("parallel",),
        ),
    )(x, w_all, b_all, mask)

    # Branches are already contiguous along N -> a single slice recovers torch.cat.
    return out_padded.reshape(b_pad, n_pad)[:B, :n_total]


def _init_params(key, embedding_dim, num_filters, kernel_sizes):
    """Deterministic Conv1d-style init; returns per-branch weights as (k, E, F) f32."""
    weights, biases = [], []
    for k in kernel_sizes:
        key, wk, bk = jax.random.split(key, 3)
        fan_in = embedding_dim * k
        bound = float(fan_in) ** -0.5
        # PyTorch Conv1d weight layout is (F, E, k); store transposed to (k, E, F).
        w_torch = jax.random.uniform(
            wk, (num_filters, embedding_dim, k), jnp.float32, -bound, bound)
        weights.append(jnp.transpose(w_torch, (2, 1, 0)))
        biases.append(jax.random.uniform(bk, (num_filters,), jnp.float32, -bound, bound))
    return weights, biases


def _reference_forward(x, weights, biases, compute_dtype=None):
    """Pure-JAX reference mirroring the PyTorch semantics (optionally bf16 matmul)."""
    outs = []
    xc = x if compute_dtype is None else x.astype(compute_dtype)
    for w, b in zip(weights, biases):
        k, E, F = w.shape
        B, L, _ = x.shape
        out_len = L - k + 1
        wc = w if compute_dtype is None else w.astype(compute_dtype)
        acc = jnp.zeros((B, out_len, F), jnp.float32)
        for j in range(k):
            acc = acc + jnp.einsum("ble,ef->blf", xc[:, j:j + out_len, :], wc[j],
                                   preferred_element_type=jnp.float32)
        acc = jnp.maximum(acc + b[None, None, :].astype(jnp.float32), 0.0)
        outs.append(jnp.max(acc, axis=1))
    return jnp.concatenate(outs, axis=1)


if __name__ == "__main__":
    batch = 2
    seq_len = 16
    embedding_dim = 128
    num_filters = 16
    kernel_sizes = (3, 4, 5)

    key = jax.random.PRNGKey(0)
    key, xk = jax.random.split(key)
    x = jax.random.normal(xk, (batch, seq_len, embedding_dim), jnp.float32)
    weights, biases = _init_params(key, embedding_dim, num_filters, kernel_sizes)

    out = textcnn_forward(x, weights, biases)
    out = jax.block_until_ready(out)
    assert out.shape == (batch, num_filters * len(kernel_sizes))

    # Reference that mirrors the kernel's bf16-matmul / f32-accumulate numerics.
    ref_bf16 = _reference_forward(x, weights, biases, compute_dtype=jnp.bfloat16)
    # Pure f32 reference (exact PyTorch semantics), checked with a bf16-level tolerance.
    ref_f32 = _reference_forward(x, weights, biases)

    assert jnp.allclose(out, ref_bf16, atol=1e-3, rtol=1e-3), "mismatch vs bf16 reference"
    assert jnp.allclose(out, ref_f32, atol=5e-2, rtol=5e-2), "mismatch vs f32 reference"
    print("KERNEL_OK")
</pallas_src>

<mosaic_0001>
module attributes {stable_mosaic.version = 11 : i64} {
  func.func @_textcnn_fused_kernel(%arg0: i32, %arg1: memref<1x16x128xf32, #tpu.memory_space<vmem>>, %arg2: memref<640x128xbf16, #tpu.memory_space<vmem>>, %arg3: memref<1x128xf32, #tpu.memory_space<vmem>>, %arg4: memref<16x128xf32, #tpu.memory_space<vmem>>, %arg5: memref<1x1x128xf32, #tpu.memory_space<vmem>>) attributes {dimension_semantics = [#tpu.dimension_semantics<parallel>], iteration_bounds = array<i64: 2>, scalar_prefetch = 0 : i64, scratch_operands = 0 : i64, tpu.core_type = #tpu.core_type<tc>, window_params = [{transform_indices = @transform_0, window_bounds = array<i64: 1, 16, 128>}, {pipeline_mode = #tpu.pipeline_mode<synchronous>, transform_indices = @transform_1, window_bounds = array<i64: 640, 128>}, {pipeline_mode = #tpu.pipeline_mode<synchronous>, transform_indices = @transform_2, window_bounds = array<i64: 1, 128>}, {pipeline_mode = #tpu.pipeline_mode<synchronous>, transform_indices = @transform_3, window_bounds = array<i64: 16, 128>}, {transform_indices = @transform_4, window_bounds = array<i64: 1, 1, 128>}]} {
    %c0 = arith.constant 0 : index
    %c0_0 = arith.constant 0 : index
    %c0_1 = arith.constant 0 : index
    %0 = vector.load %arg1[%c0, %c0_0, %c0_1] : memref<1x16x128xf32, #tpu.memory_space<vmem>>, vector<1x16x128xf32>
    %1 = arith.truncf %0 : vector<1x16x128xf32> to vector<1x16x128xbf16>
    %cst = arith.constant 0.000000e+00 : bf16
    %2 = vector.broadcast %cst : bf16 to vector<1x16x128xbf16>
    %3 = tpu.concatenate %1, %2 in 1 : vector<1x16x128xbf16>, vector<1x16x128xbf16> -> vector<1x32x128xbf16>
    %4 = vector.extract_strided_slice %3 {offsets = [0, 0, 0], sizes = [1, 16, 128], strides = [1, 1, 1]} : vector<1x32x128xbf16> to vector<1x16x128xbf16>
    %5 = vector.extract_strided_slice %3 {offsets = [0, 1, 0], sizes = [1, 16, 128], strides = [1, 1, 1]} : vector<1x32x128xbf16> to vector<1x16x128xbf16>
    %6 = vector.extract_strided_slice %3 {offsets = [0, 2, 0], sizes = [1, 16, 128], strides = [1, 1, 1]} : vector<1x32x128xbf16> to vector<1x16x128xbf16>
    %7 = vector.extract_strided_slice %3 {offsets = [0, 3, 0], sizes = [1, 16, 128], strides = [1, 1, 1]} : vector<1x32x128xbf16> to vector<1x16x128xbf16>
    %8 = vector.extract_strided_slice %3 {offsets = [0, 4, 0], sizes = [1, 16, 128], strides = [1, 1, 1]} : vector<1x32x128xbf16> to vector<1x16x128xbf16>
    %9 = tpu.concatenate %4, %5, %6, %7, %8 in 2 : vector<1x16x128xbf16>, vector<1x16x128xbf16>, vector<1x16x128xbf16>, vector<1x16x128xbf16>, vector<1x16x128xbf16> -> vector<1x16x640xbf16>
    %10 = vector.shape_cast %9 : vector<1x16x640xbf16> to vector<16x640xbf16>
    %c0_2 = arith.constant 0 : index
    %c0_3 = arith.constant 0 : index
    %11 = vector.load %arg2[%c0_2, %c0_3] : memref<640x128xbf16, #tpu.memory_space<vmem>>, vector<640x128xbf16>
    %cst_4 = arith.constant dense<0.000000e+00> : vector<16x128xf32>
    %12 = tpu.matmul %10, %11, %cst_4 {dimension_numbers = #tpu.dot_dimension_numbers<[1], [0], [0], [1], [0, 0, 1, 1], [], []>} : vector<16x640xbf16>, vector<640x128xbf16>, vector<16x128xf32> -> vector<16x128xf32>
    %13 = vector.shape_cast %12 : vector<16x128xf32> to vector<1x16x128xf32>
    %c0_5 = arith.constant 0 : index
    %c0_6 = arith.constant 0 : index
    %14 = vector.load %arg4[%c0_5, %c0_6] : memref<16x128xf32, #tpu.memory_space<vmem>>, vector<16x128xf32>
    %15 = vector.shape_cast %14 : vector<16x128xf32> to vector<1x16x128xf32>
    %16 = arith.addf %13, %15 : vector<1x16x128xf32>
    %cst_7 = arith.constant dense<0xFF800000> : vector<1x128xf32>
    %17 = vector.multi_reduction <maximumf>, %16, %cst_7 [1] : vector<1x16x128xf32> to vector<1x128xf32>
    %c0_8 = arith.constant 0 : index
    %c0_9 = arith.constant 0 : index
    %18 = vector.load %arg3[%c0_8, %c0_9] : memref<1x128xf32, #tpu.memory_space<vmem>>, vector<1x128xf32>
    %19 = arith.addf %17, %18 : vector<1x128xf32>
    %cst_10 = arith.constant 0.000000e+00 : f32
    %20 = vector.broadcast %cst_10 : f32 to vector<1x128xf32>
    %21 = arith.maximumf %19, %20 : vector<1x128xf32>
    %c0_11 = arith.constant 0 : index
    %c0_12 = arith.constant 0 : index
    %c0_13 = arith.constant 0 : index
    %22 = vector.load %arg5[%c0_11, %c0_12, %c0_13] : memref<1x1x128xf32, #tpu.memory_space<vmem>>, vector<1x1x128xf32>
    %23 = vector.shape_cast %22 : vector<1x1x128xf32> to vector<1x128xf32>
    %24 = vector.shape_cast %21 : vector<1x128xf32> to vector<1x1x128xf32>
    tpu.vector_store %arg5[%c0_11, %c0_12, %c0_13], %24 {strides = array<i32>} : memref<1x1x128xf32, #tpu.memory_space<vmem>>, vector<1x1x128xf32>,
    return
  }
  func.func @transform_0(%arg0: i32) -> (i32, i32, i32) {
    %c0_i32 = arith.constant 0 : i32
    %c0_i32_0 = arith.constant 0 : i32
    %c0_i32_1 = arith.constant 0 : i32
    return %arg0, %c0_i32, %c0_i32_0 : i32, i32, i32
  }
  func.func @transform_1(%arg0: i32) -> (i32, i32) {
    %c0_i32 = arith.constant 0 : i32
    %c0_i32_0 = arith.constant 0 : i32
    %c0_i32_1 = arith.constant 0 : i32
    return %c0_i32, %c0_i32_0 : i32, i32
  }
  func.func @transform_2(%arg0: i32) -> (i32, i32) {
    %c0_i32 = arith.constant 0 : i32
    %c0_i32_0 = arith.constant 0 : i32
    %c0_i32_1 = arith.constant 0 : i32
    return %c0_i32, %c0_i32_0 : i32, i32
  }
  func.func @transform_3(%arg0: i32) -> (i32, i32) {
    %c0_i32 = arith.constant 0 : i32
    %c0_i32_0 = arith.constant 0 : i32
    %c0_i32_1 = arith.constant 0 : i32
    return %c0_i32, %c0_i32_0 : i32, i32
  }
  func.func @transform_4(%arg0: i32) -> (i32, i32, i32) {
    %c0_i32 = arith.constant 0 : i32
    %c0_i32_0 = arith.constant 0 : i32
    %c0_i32_1 = arith.constant 0 : i32
    return %arg0, %c0_i32, %c0_i32_0 : i32, i32, i32
  }
}

</mosaic_0001>

<bundles_post_ra>
// kernel: tpu_custom_call.1
= control target key start
LH: loop header
LB: loop body
LE: loop exit
PB: predicated region body
PF: predicated region fallthrough
CT: control target
= control target key end

     0   :  { %9 = vsyncpa [#allocation3], 0  ;;  %s1524_s0 = inlined_call_operand.hbm [shape: f32[2,16,128], index: 0, kind: input, shape index: {}]   ;;  %s1525_s1 = inlined_call_operand.hbm [shape: bf16[640,128], index: 1, kind: input, shape index: {}]   ;;  %s1526_s2 = inlined_call_operand.vmem [shape: f32[1,128], index: 2, kind: input, shape index: {}]   ;;  %s1527_s3 = inlined_call_operand.hbm [shape: f32[16,128], index: 3, kind: input, shape index: {}]   ;;  %s1528_s4 = inlined_call_operand.hbm [shape: f32[2,1,128], index: 4, kind: output, shape index: {}]  }
   0x1   :  { %11 = vsyncpa [#allocation3 + $0x1], 0 }
   0x2   :  { %12 = vsyncpa [#allocation6], 0 }
   0x3   :  { %13 = vsyncpa [#allocation4], 0 }
   0x4   :  { %15 = vsyncpa [#allocation4 + $0x1], 0  ;;  %s1278_s15 = smov 0   ;;  %s1280_s16 = smov 0  }
   0x5   :  { %s1282_s17 = smov 0   ;;  %s1284_s18 = smov 0  }
   0x6 LB: > { %s1299_s19 = sadd.s32 4294967295, %s1240_s18   ;;  %s841_s20 = sadd.s32 4294967294, %s1240_s18   ;;  %s1240_s18 = sphi %s1284_s18, %s1548_s18   ;;  %s1236_s17 = sphi %s1282_s17, %s1547_s17   ;;  %s1232_s16 = sphi %s1280_s16, %s1546_s16   ;;  %s1228_s15 = sphi %s1278_s15, %s1545_s15  }
   0x7   : > { %p41_p0 = scmp.ne.s32.totalorder %s1232_s16, %s1228_s15  ;;  %p1529_p1 = scmp.eq.s32.totalorder %s1299_s19, 0 }
   0x8   : > { %p134_p3 = scmp.eq.s32.totalorder %s841_s20, 1  ;;  %p842_p5 = scmp.ge.s32.totalorder %s1240_s18, 1 }
   0x9   : > { %p1308_p4 = por %p1529_p1, %p41_p0  ;;  %p141_p7 = scmp.lt.s32.totalorder %s1240_s18, 3 }
   0xa   : > { %p1313_p6 = por %p134_p3, %p41_p0  ;;  %s1242_s24 = smov [#allocation5]  }
   0xb   : > { %s1532_s21 = scalar_select %p1308_p4, 1, 0 }
   0xc   : > { %s1533_s22 = scalar_select %p1313_p6, 1, 0 }
   0xd   : > { %p1318_p8 = pnand %p842_p5, %p141_p7  ;;  %s153_s25 = sshll.u32 %s1242_s24, 4  ;;  %s1322_s25 = int_to_ptr.vmem [resolvable:$true] %s153_s25 }
   0xe   : > { %s1243_s27 = smov [#allocation7]   ;;  %s1084_s5 = scalar_lea.hbm %s1525_s1, 5120 }
   0xf   : > { %p982_p9 = pneg %p1318_p8  ;;  %s169_s28 = sshll.u32 %s1243_s27, 4  ;;  %s1333_s28 = int_to_ptr.vmem [resolvable:$true] %s169_s28 }
  0x10   : > { %p1085_p12 = scmp.ne.s32.totalorder %s1525_s1, %s1084_s5  ;;  %p1091_p5 = scmp.lt.u32.totalorder %s1084_s5, %s1525_s1 }
  0x11   : > { %p1329_p11 = pnand %p982_p9, %p1529_p1 }
  0x13   : > { %p1086_p13 = pneg %p1329_p11 }
  0x15   : > { %p1087_p0 = pnand %p1086_p13, %p1085_p12 }
  0x17   : > { %p1088_p3 = pneg %p1087_p0 }
  0x19   : > { %p1093_p7 = pnand %p1091_p5, %p1088_p3 }
  0x1b   : > { %1096 = shalt.err (!%p1093_p7)
}
  0x1c   : > { %s1097_s10 = scalar_lea.vmem %s1322_s25, 5120  ;;  %p1105_p2 = scmp.lt.s32.totalorder %s1322_s25, %s1322_s25 }
  0x1d   : > { %p1098_p9 = scmp.ne.s32.totalorder %s1322_s25, %s1097_s10  ;;  %p1106_p12 = scmp.lt.s32.totalorder %s1097_s10, %s1097_s10 }
  0x1f   : > { %p1100_p10 = pnand %p1098_p9, %p1086_p13  ;;  %p1107_p0 = por %p1106_p12, %p1105_p2 }
  0x21   : > { %p1101_p1 = pneg %p1100_p10 }
  0x23   : > { %p1108_p6 = pnand %p1107_p0, %p1101_p1 }
  0x25   : > { %1111 = shalt.err (!%p1108_p6)
}
  0x26   : > { %s1244_s11 = smov 64   ;;  %s1245_s12 = smov 4  }
  0x27   : > { %985 = dma.hbm_to_vmem [thread:$0]  (!%p1329_p11), %s1525_s1, 5120, %s1322_s25, [#allocation6], %s1244_s11, %s1244_s11, %s1245_s12  }
  0x28   : > { %s1112_s27 = scalar_lea.hbm %s1527_s3, 256 }
  0x29   : > { %p1113_p2 = scmp.ne.s32.totalorder %s1527_s3, %s1112_s27  ;;  %p1119_p10 = scmp.lt.u32.totalorder %s1112_s27, %s1527_s3 }
  0x2b   : > { %p1115_p1 = pnand %p1113_p2, %p1086_p13 }
  0x2d   : > { %p1116_p6 = pneg %p1115_p1 }
  0x2f   : > { %p1121_p3 = pnand %p1119_p10, %p1116_p6 }
  0x31   : > { %1124 = shalt.err (!%p1121_p3)
}
  0x32   : > { %s1125_s25 = scalar_lea.vmem %s1333_s28, 256  ;;  %p1133_p12 = scmp.lt.s32.totalorder %s1333_s28, %s1333_s28 }
  0x33   : > { %p1126_p5 = scmp.ne.s32.totalorder %s1333_s28, %s1125_s25  ;;  %p1134_p0 = scmp.lt.s32.totalorder %s1125_s25, %s1125_s25 }
  0x35   : > { %p1128_p7 = pnand %p1126_p5, %p1086_p13  ;;  %p1135_p2 = por %p1134_p0, %p1133_p12 }
  0x37   : > { %p1129_p9 = pneg %p1128_p7 }
  0x39   : > { %p1136_p1 = pnand %p1135_p2, %p1129_p9 }
  0x3b   : > { %1139 = shalt.err (!%p1136_p1)
}
  0x3c   : > { %s1246_s7 = smov 128   ;;  %s1247_s8 = smov 8  }
  0x3d   : > { %988 = dma.hbm_to_vmem [thread:$0]  (!%p1329_p11), %s1527_s3, 256, %s1333_s28, [#allocation6], %s1246_s7, %s1246_s7, %s1247_s8  }
  0x3e   : > { %s1391_s11 = sadd.s32 1, %s1240_s18   ;;  %s28_s13 = sadd.s32 1, %s1236_s17 }
  0x3f   : > { %s25_s12 = ssub.s32 %s1240_s18, %s1391_s11  ;;  %p35_p6 = scmp.ne.s32.totalorder %s1236_s17, %s1232_s16 }
  0x40   : > { %p26_p13 = scmp.eq.s32.totalorder %s25_s12, 0  ;;  %p36_p10 = scmp.eq.s32.totalorder %s1240_s18, 0 }
  0x41   : > { %p1536_p5 = scmp.eq.s32.totalorder %s1299_s19, 1  ;;  %p999_p9 = scmp.lt.s32.totalorder %s1240_s18, 2 }
  0x42   : > { %s1400_s14 = scalar_select %p26_p13, %s1236_s17, %s28_s13  }
  0x43   : > { %p37_p3 = por %p36_p10, %p35_p6  ;;  %p1404_p7 = por %p1536_p5, %p35_p6 }
  0x44   : > { %s183_s20 = sand.u32 1, %s1236_s17   ;;  %s896_s28 = sshll.u32 %s1240_s18, 8 }
  0x45   : > { %s1537_s26 = scalar_select %p1404_p7, 1, 0 }
  0x46   : > { %s846_s24 = sshll.u32 %s183_s20, 4  ;;  %s1414_s30 = scalar_lea.hbm %s1524_s0, %s896_s28 }
  0x47   : > { %s187_s5 = scalar_lea.vmem [#allocation2], %s846_s24  ;;  %p1418_p11 = pnand %p999_p9, %p37_p3 }
  0x48   : > { %s194_s6 = sshll.u32 %s187_s5, 4  ;;  %s1422_s9 = scalar_lea.sflag [#allocation3], %s183_s20  ;;  %s1416_s6 = int_to_ptr.vmem [resolvable:$true] %s194_s6 }
  0x49   : > { %s1140_s10 = scalar_lea.hbm %s1414_s30, 256  ;;  %p1142_p0 = pneg %p1418_p11 }
  0x4a   : > { %p1141_p12 = scmp.ne.s32.totalorder %s1414_s30, %s1140_s10  ;;  %s1145_s24 = scalar_lea.hbm %s1524_s0, 512 }
  0x4b   : > { %p1146_p13 = scmp.lt.u32.totalorder %s1414_s30, %s1524_s0  ;;  %p1147_p6 = scmp.lt.u32.totalorder %s1145_s24, %s1140_s10 }
  0x4c   : > { %p1143_p2 = pnand %p1142_p0, %p1141_p12  ;;  %p1149_p3 = scmp.lt.u32.totalorder %s1140_s10, %s1414_s30 }
  0x4d   : > { %p1148_p10 = por %p1147_p6, %p1146_p13 }
  0x4e   : > { %p1144_p1 = pneg %p1143_p2 }
  0x4f   : > { %p1150_p5 = por %p1149_p3, %p1148_p10 }
  0x51   : > { %p1151_p9 = pnand %p1150_p5, %p1144_p1 }
  0x53   : > { %1154 = shalt.err (!%p1151_p9)
}
  0x54   : > { %s1155_s20 = scalar_lea.vmem %s1416_s6, 256  ;;  %s1248_s29 = smov [#allocation2]  }
  0x55   : > { %p1156_p12 = scmp.ne.s32.totalorder %s1416_s6, %s1155_s20  ;;  %s1160_s5 = sshll.u32 %s1248_s29, 4  ;;  %s1161_s5 = int_to_ptr.vmem [resolvable:$false] %s1160_s5 }
  0x56   : > { %s1162_s12 = scalar_lea.vmem %s1161_s5, 512  ;;  %p1163_p4 = scmp.lt.s32.totalorder %s1416_s6, %s1161_s5 }
  0x57   : > { %p1158_p2 = pnand %p1156_p12, %p1142_p0  ;;  %p1164_p13 = scmp.lt.s32.totalorder %s1162_s12, %s1155_s20 }
  0x59   : > { %p1159_p7 = pneg %p1158_p2  ;;  %p1165_p6 = por %p1164_p13, %p1163_p4 }
  0x5b   : > { %p1166_p10 = pnand %p1165_p6, %p1159_p7 }
  0x5d   : > { %1169 = shalt.err (!%p1166_p10)
}
  0x5e   : > { %992 = dma.hbm_to_vmem [thread:$0]  (!%p1418_p11), %s1414_s30, 256, %s1416_s6, %s1422_s9, %s1246_s7, %s1246_s7, %s1247_s8  }
  0x5f   : > { %206 = sbr.rel (%p1318_p8) target bundleno = 422 (0x1a6), region = 36  ;;  %s1456_s10 = sand.u32 (!%p1318_p8), 1, %s1232_s16  }
  0x60   : > { %s850_s13 = sshll.u32 (!%p1318_p8), %s1456_s10, 4  ;;  %s209_s24 = scalar_lea.sflag (!%p1318_p8), [#allocation3], %s1456_s10 }
  0x61   : > { %s1460_s28 = scalar_lea.vmem (!%p1318_p8), [#allocation2], %s850_s13  ;;  %p1539_p4 = scmp.ne.s32.totalorder (!%p1318_p8), %s1532_s21, 0 }
  0x66   : > { %1215 = dma.done.wait (%p1539_p4), %s209_s24, 256  }
  0x67   : > { %1217 = vsyncadd (%p1539_p4), %s209_s24, 4294967040  ;;  %p1540_p7 = scmp.eq.s32.totalorder %s1299_s19, 0 }
  0x69   : > { %1219 = dma.done.wait (%p1540_p7), [#allocation6], 5376   ;;  %p1541_p8 = pmov %p1540_p7 }
  0x6a   : > { %v1044_v0 = vld [vmem:[#allocation5 + $0x40] sm:$0xff]   ;;  %v1048_v4 = vld [vmem:[#allocation5 + $0x48] sm:$0xff]   ;;  %v1052_v8 = vld [vmem:[#allocation5 + $0x50] sm:$0xff]   ;;  %v1249_v35 = vmov 0   ;;  %v1250_v38 = vmov 0.0   ;;  %vm264_vm2 = vcmask 1046528  }
  0x6b   : > { %1221 = vsyncadd (%p1541_p8), [#allocation6], 4294961920  ;;  %v1045_v1 = vld [vmem:[#allocation5 + $0xc0] sm:$0xff]   ;;  %897 = vmatprep.subr.bf16.mxu0 %v1044_v0  ;;  %v1049_v5 = vld [vmem:[#allocation5 + $0xc8] sm:$0xff]   ;;  %v259_v36 = vrot.slane %v1249_v35, 1  ;;  %v276_v37 = vrot.slane %v1249_v35, 2 }
  0x6c   : > { %v1046_v2 = vld [vmem:[#allocation5] sm:$0xff]   ;;  %919 = vmatprep.subr.bf16.mxu1 %v1045_v1  ;;  %v1050_v6 = vld [vmem:[#allocation5 + $0x8] sm:$0xff]   ;;  %v1053_v9 = vld [vmem:[#allocation5 + $0xd0] sm:$0xff]   ;;  %vm248_vm0 = vsmask.f32 7424  ;;  %vm1251_vm3 = vmmov 0  }
  0x6d   : > { %v1047_v3 = vld [vmem:[#allocation5 + $0x80] sm:$0xff]   ;;  %898 = vmatpush3.bf16.msra.mxu0 %v1046_v2  ;;  %v1051_v7 = vld [vmem:[#allocation5 + $0x88] sm:$0xff]   ;;  %v1054_v10 = vld [vmem:[#allocation5 + $0x10] sm:$0xff]   ;;  %vm269_vm1 = vsmask.f32 6400  ;;  %v277_v45 = vor.u32 %v276_v37, %v259_v36  ;;  %vm280_vm4 = vcmask 1045504  }
  0x6e   : > { %920 = vmatpush3.bf16.msra.mxu1 %v1047_v3  ;;  %899 = vmatprep.subr.bf16.mxu0 %v1048_v4  ;;  %v1055_v11 = vld [vmem:[#allocation5 + $0x90] sm:$0xff]   ;;  %v1056_v12 = vld [vmem:[#allocation5 + $0x58] sm:$0xff]   ;;  %v1060_v16 = vld [vmem:[#allocation5 + $0x60] sm:$0xff]   ;;  %s893_s7 = sshll.u32 %s1299_s19, 4  ;;  %s243_s8 = scalar_lea.vmem [#allocation8], %s1456_s10 }
  0x6f   : > { %921 = vmatprep.subr.bf16.mxu1 %v1049_v5  ;;  %v1057_v13 = vld [vmem:[#allocation5 + $0xd8] sm:$0xff]   ;;  %v1061_v17 = vld [vmem:[#allocation5 + $0xe0] sm:$0xff]   ;;  %v1064_v20 = vld [vmem:[#allocation5 + $0x68] sm:$0xff]   ;;  %s756_s30 = sshll.u32 %s243_s8, 4  ;;  %s1480_s9 = scalar_lea.hbm %s1528_s4, %s893_s7  ;;  %s1482_s30 = int_to_ptr.vmem [resolvable:$true] %s756_s30 }
  0x70   : > { %v1058_v14 = vld [vmem:[#allocation5 + $0x18] sm:$0xff]   ;;  %v1062_v18 = vld [vmem:[#allocation5 + $0x20] sm:$0xff]   ;;  %v1065_v21 = vld [vmem:[#allocation5 + $0xe8] sm:$0xff]   ;;  %s744_s27 = scalar_lea.sflag [#allocation4], %s1456_s10  ;;  %s1170_s20 = scalar_lea.vmem %s1482_s30, 16 }
  0x71   : > { %900 = vmatpush3.bf16.msra.mxu0 %v1050_v6  ;;  %v1059_v15 = vld [vmem:[#allocation5 + $0x98] sm:$0xff]   ;;  %v1063_v19 = vld [vmem:[#allocation5 + $0xa0] sm:$0xff]   ;;  %v1066_v22 = vld [vmem:[#allocation5 + $0x28] sm:$0xff]   ;;  %p1171_p11 = scmp.ne.s32.totalorder %s1482_s30, %s1170_s20  ;;  %p1542_p0 = scmp.ne.s32.totalorder %s1537_s26, 0 }
  0x72   : > { %922 = vmatpush3.bf16.msra.mxu1 %v1051_v7  ;;  %901 = vmatprep.subr.bf16.mxu0 %v1052_v8  ;;  %v1067_v23 = vld [vmem:[#allocation5 + $0xa8] sm:$0xff]   ;;  %v1068_v24 = vld [vmem:[#allocation5 + $0x70] sm:$0xff]   ;;  %v1072_v28 = vld [vmem:[#allocation5 + $0x78] sm:$0xff]   ;;  %s1252_s19 = smov [#allocation8]  }
  0x73   : > { %923 = vmatprep.subr.bf16.mxu1 %v1053_v9  ;;  %v1069_v25 = vld [vmem:[#allocation5 + $0xf0] sm:$0xff]   ;;  %v1073_v29 = vld [vmem:[#allocation5 + $0xf8] sm:$0xff]   ;;  %v1076_v49 = vld [vmem:[#allocation5 + $0x100] sm:$0xff]   ;;  %p1172_p1 = pnand %p1171_p11, %p1542_p0  ;;  %s1174_s29 = sshll.u32 %s1252_s19, 4  ;;  %s1175_s29 = int_to_ptr.vmem [resolvable:$false] %s1174_s29 }
  0x74   : > { %v1070_v26 = vld [vmem:[#allocation5 + $0x30] sm:$0xff]   ;;  %v1074_v30 = vld [vmem:[#allocation5 + $0x38] sm:$0xff]   ;;  %v1077_v52 = vld [vmem:[#allocation5 + $0x108] sm:$0xff]   ;;  %s1176_s5 = scalar_lea.vmem %s1175_s29, 32  ;;  %p1177_p5 = scmp.lt.s32.totalorder %s1482_s30, %s1175_s29 }
  0x75   : > { %902 = vmatpush3.bf16.msra.mxu0 %v1054_v10  ;;  %v1071_v27 = vld [vmem:[#allocation5 + $0xb0] sm:$0xff]   ;;  %v1075_v31 = vld [vmem:[#allocation5 + $0xb8] sm:$0xff]   ;;  %v1080_v55 = vld [vmem:[#allocation5 + $0x120] sm:$0xff]   ;;  %p1173_p3 = pneg %p1172_p1  ;;  %p1178_p9 = scmp.lt.s32.totalorder %s1176_s5, %s1170_s20 }
  0x76   : > { %924 = vmatpush3.bf16.msra.mxu1 %v1055_v11  ;;  %903 = vmatprep.subr.bf16.mxu0 %v1056_v12  ;;  %v245_v32 = vld [vmem:[%s1460_s28] sm:$0xff]  ;;  %v246_v33 = vld [vmem:[%s1460_s28 + $0x8] sm:$0xff] }
  0x77   : > { %925 = vmatprep.subr.bf16.mxu1 %v1057_v13  ;;  %v247_v34 = vpack.c.bf16 %v246_v33, %v245_v32  ;;  %v1078_v53 = vld [vmem:[#allocation5 + $0x110] sm:$0xff]   ;;  %v1079_v54 = vld [vmem:[#allocation5 + $0x118] sm:$0xff]   ;;  %v1081_v56 = vld [vmem:[#allocation5 + $0x128] sm:$0xff]   ;;  %p1179_p12 = por %p1178_p9, %p1177_p5 }
  0x78   : > { %v1082_v57 = vld [vmem:[#allocation5 + $0x130] sm:$0xff]   ;;  %v1083_v58 = vld [vmem:[#allocation5 + $0x138] sm:$0xff]  }
  0x79   : > { %904 = vmatpush3.bf16.msra.mxu0 %v1058_v14  ;;  %v250_v39 = vshrl.u32 %v247_v34, 16  ;;  %v252_v40 = vshll.u32 %v247_v34, 16  ;;  %v265_v41 = vrot.slane %v247_v34, 1  ;;  %v281_v59 = vrot.slane %v247_v34, 2  ;;  %v728_v14 = vld [vmem:[#allocation7] sm:$0xff]  ;;  %p1180_p2 = pnand %p1179_p12, %p1173_p3 }
  0x7a   : > { %926 = vmatpush3.bf16.msra.mxu1 %v1059_v15  ;;  %905 = vmatprep.subr.bf16.mxu0 %v1060_v16  ;;  %v729_v16 = vld [vmem:[#allocation7 + $0x8] sm:$0xff] }
  0x7b   : > { %927 = vmatprep.subr.bf16.mxu1 %v1061_v17  ;;  %v254_v42 = vrot.slane %v252_v40, 1  ;;  %v270_v43 = vrot.slane %v250_v39, 1  ;;  %v271_v44 = vrot.slane %v252_v40, 2  ;;  %v267_v48 = vsel %vm264_vm2, %v265_v41, %v259_v36 }
  0x7c   : > { %v283_v60 = vsel %vm280_vm4, %v281_v59, %v276_v37 }
  0x7d   : > { %906 = vmatpush3.bf16.msra.mxu0 %v1062_v18  ;;  %v255_v46 = vor.u32 %v254_v42, %v250_v39  ;;  %v272_v47 = vor.u32 %v271_v44, %v270_v43 }
  0x7e   : > { %928 = vmatpush3.bf16.msra.mxu1 %v1063_v19  ;;  %907 = vmatprep.subr.bf16.mxu0 %v1064_v20 }
  0x7f   : > { %929 = vmatprep.subr.bf16.mxu1 %v1065_v21  ;;  %v260_v50 = vsel %vm248_vm0, %v255_v46, %v259_v36  ;;  %v278_v51 = vsel %vm269_vm1, %v272_v47, %v277_v45 }
  0x80   : > { %637 = vmatprep.mubr.bf16.mxu0 %v260_v50  ;;  %678 = vmatprep.mubr.bf16.mxu1 %v278_v51 }
  0x81   : > { %908 = vmatpush3.bf16.msra.mxu0 %v1066_v22 }
  0x82   : > { %930 = vmatpush3.bf16.msra.mxu1 %v1067_v23  ;;  %909 = vmatprep.subr.bf16.mxu0 %v1068_v24 }
  0x83   : > { %931 = vmatprep.subr.bf16.mxu1 %v1069_v25 }
  0x85   : > { %910 = vmatpush3.bf16.msra.mxu0 %v1070_v26 }
  0x86   : > { %932 = vmatpush3.bf16.msra.mxu1 %v1071_v27  ;;  %911 = vmatprep.subr.bf16.mxu0 %v1072_v28  ;;  %v739_v27 = vld [vmem:[%s1526_s2] sm:$0x1] }
  0x87   : > { %933 = vmatprep.subr.bf16.mxu1 %v1073_v29 }
  0x89   : > { %912 = vmatpush3.bf16.msra.mxu0 %v1074_v30 }
  0x8a   : > { %934 = vmatpush3.bf16.msra.mxu1 %v1075_v31  ;;  %950 = vmatprep.subr.bf16.mxu0 %v1250_v38 }
  0x8c   : > { %638 = vmatmul.mubr.bf16.vlgmr.msra.gmra.mrb[0].mxu0 %v247_v34 }
  0x8d   : > { %679 = vmatmul.mubr.bf16.vlgmr.msra.gmra.mrb[0].mxu1 %v267_v48  ;;  %951 = vmatpush3.bf16.msra.mxu0 %v1076_v49 }
  0x8e   : > { %966 = vmatprep.mubr.msk.bf16.mxu0 %vm1251_vm3, %v1250_v38  ;;  %952 = vmatprep.subr.bf16.mxu0 %v1250_v38 }
  0x91   : > { %953 = vmatpush3.bf16.msra.mxu0 %v1077_v52 }
  0x92   : > { %954 = vmatprep.subr.bf16.mxu0 %v1250_v38 }
  0x95   : > { %955 = vmatpush3.bf16.msra.mxu0 %v1078_v53 }
  0x96   : > { %956 = vmatprep.subr.bf16.mxu0 %v1250_v38 }
  0x99   : > { %957 = vmatpush3.bf16.msra.mxu0 %v1079_v54 }
  0x9a   : > { %958 = vmatprep.subr.bf16.mxu0 %v1250_v38 }
  0x9d   : > { %959 = vmatpush3.bf16.msra.mxu0 %v1080_v55 }
  0x9e   : > { %960 = vmatprep.subr.bf16.mxu0 %v1250_v38 }
  0xa1   : > { %961 = vmatpush3.bf16.msra.mxu0 %v1081_v56 }
  0xa2   : > { %962 = vmatprep.subr.bf16.mxu0 %v1250_v38 }
  0xa5   : > { %963 = vmatpush3.bf16.msra.mxu0 %v1082_v57 }
  0xa6   : > { %964 = vmatprep.subr.bf16.mxu0 %v1250_v38 }
  0xa9   : > { %965 = vmatpush3.bf16.msra.mxu0 %v1083_v58 }
  0xac   : > { %967 = vmatmul.mubr.bf16.vlgmr.msra.gmra.mrb[4].mxu0 %v283_v60 }
 0x15f   : > { %v913_v61 = vpop.f32.mrb[0].mxu0 }
 0x160   : > { %v935_v62 = vpop.f32.mrb[0].mxu1  ;;  %v914_v63 = vpop.f32.mrb[1].mxu0 }
 0x161   : > { %v936_v0 = vpop.f32.mrb[1].mxu1  ;;  %v915_v1 = vadd.f32 %v914_v63, %v913_v61  ;;  %v916_v3 = vpop.f32.mrb[2].mxu0 }
 0x162   : > { %v937_v2 = vadd.f32 %v936_v0, %v935_v62  ;;  %v938_v4 = vpop.f32.mrb[2].mxu1  ;;  %v917_v5 = vpop.f32.mrb[3].mxu0 }
 0x163   : > { %v939_v6 = vpop.f32.mrb[3].mxu1  ;;  %v918_v7 = vadd.f32 %v917_v5, %v916_v3 }
 0x164   : > { %v940_v8 = vadd.f32 %v939_v6, %v938_v4  ;;  %v681_v9 = vadd.f32 %v937_v2, %v915_v1 }
 0x166   : > { %v684_v10 = vadd.f32 %v940_v8, %v918_v7 }
 0x17f   : > { %v721_v11 = vpop.f32.mrb[4].mxu0 }
 0x180   : > { %v722_v12 = vadd.f32 %v721_v11, %v681_v9  ;;  %v968_v13 = vpop.f32.mrb[5].mxu0 }
 0x181   : > { %v724_v15 = vpop.f32.mrb[6].mxu0 }
 0x182   : > { %v725_v17 = vadd.f32 %v724_v15, %v684_v10  ;;  %v969_v18 = vpop.f32.mrb[7].mxu0  ;;  %v730_v19 = vadd.f32 %v728_v14, %v722_v12 }
 0x184   : > { %v731_v20 = vadd.f32 %v729_v16, %v725_v17 }
 0x186   : > { %v732_v21 = vmax.f32 %v730_v19, %v731_v20 }
 0x188   : > { %v733_v22 = vrot.slane %v732_v21, 4 }
 0x18a   : > { %v734_v23 = vmax.f32 %v732_v21, %v733_v22 }
 0x18c   : > { %v735_v24 = vrot.slane %v734_v23, 2 }
 0x18e   : > { %v736_v25 = vmax.f32 %v734_v23, %v735_v24 }
 0x190   : > { %v737_v26 = vrot.slane %v736_v25, 1 }
 0x192   : > { %v738_v28 = vmax.f32 %v736_v25, %v737_v26 }
 0x194   : > { %v740_v29 = vadd.f32 %v739_v27, %v738_v28 }
 0x196   : > { %v741_v30 = vmax.f32 %v740_v29, 0.0 }
 0x198   : > { %742 = vst [vmem:[%s243_s8] sm:$0x1] %v741_v30 }
 0x199   : > { %1183 = shalt.err (!%p1180_p2)
}
 0x19a   : > { %s1184_s12 = scalar_lea.hbm %s1480_s9, 16  ;;  %s1188_s24 = scalar_lea.hbm %s1528_s4, 32 }
 0x19b   : > { %p1185_p13 = scmp.ne.s32.totalorder %s1480_s9, %s1184_s12  ;;  %p1189_p4 = scmp.lt.u32.totalorder %s1480_s9, %s1528_s4 }
 0x19c   : > { %p1190_p7 = scmp.lt.u32.totalorder %s1188_s24, %s1184_s12  ;;  %p1192_p11 = scmp.lt.u32.totalorder %s1184_s12, %s1480_s9 }
 0x19d   : > { %p1186_p6 = pnand %p1185_p13, %p1542_p0 }
 0x19e   : > { %p1191_p8 = por %p1190_p7, %p1189_p4 }
 0x19f   : > { %p1187_p10 = pneg %p1186_p6 }
 0x1a0   : > { %p1193_p1 = por %p1192_p11, %p1191_p8 }
 0x1a2   : > { %p1194_p3 = pnand %p1193_p1, %p1187_p10 }
 0x1a4   : > { %1197 = shalt.err (!%p1194_p3)
}
 0x1a5   : > { %980 = dma.vmem_to_hbm [thread:$0]  (%p1542_p0), %s1482_s30, 16, %s1480_s9, %s744_s27  }
 0x1a6 PF: > { %s768_s23 = sand.u32 1, %s1228_s15   ;;  %p1543_p5 = scmp.ne.s32.totalorder %s1533_s22, 0 }
 0x1a7   : > { %p1544_p9 = scmp.ge.s32.totalorder %s1240_s18, 2  ;;  %s769_s7 = scalar_lea.sflag [#allocation4], %s768_s23 }
 0x1a9   : > { %p994_p12 = pnand %p1544_p9, %p1543_p5 }
 0x1ab   : > { %1223 = dma.done.wait (!%p994_p12), %s769_s7, 16  }
 0x1ac   : > { %1225 = vsyncadd (!%p994_p12), %s769_s7, 4294967280  ;;  %p18_p2 = scmp.ge.s32.totalorder %s1391_s11, 4   ;;  %s1545_s15 = smov %s1232_s16 }
 0x1ad   : > { %s1546_s16 = smov %s1236_s17  ;;  %s1547_s17 = smov %s1400_s14 }
 0x1ae   : > { %s1548_s18 = smov %s1391_s11  ;;  %20 = sbr.rel (!%p18_p2) target bundleno = 6 (0x6), region = 89 }
 0x1b5   :  { %773 = vsyncpa [#allocation3], 1 }
 0x1b6   :  { %775 = vsyncpa [#allocation3 + $0x1], 1 }
 0x1b7   :  { %776 = vsyncpa [#allocation6], 1 }
 0x1b8   :  { %777 = vsyncpa [#allocation4], 1 }
 0x1b9   :  { %779 = vsyncpa [#allocation4 + $0x1], 1 }

</bundles_post_ra>
